<compile_context>
chip_gen: v7x
topology: tpu7x:2x2x1
jax: 0.10.0
libtpu: 0.0.40
codegen_flags: <defaults>
</compile_context>

<pallas_src>
import functools

import jax
import jax.numpy as jnp
from jax.experimental import pallas as pl
from jax.experimental.pallas import tpu as pltpu


def _gen_all_sims_kernel(x_ref, z_ref, w1x_ref, w1z_ref, b1_ref, w2_ref, b2_ref,
                         o_ref, *, n_sim, batch, out_dim, mxu_dtype):
    """All n_sim simulations of the generator in one fused pass.

    x_ref  : (B, Din)     conditioning input (shared by every simulation)
    z_ref  : (S*B, NZ)    per-simulation noise, simulation-major row order
    w1x_ref: (Din, H)     w1z_ref: (NZ, H)     b1_ref: (1, H)
    w2_ref : (H, O)       b2_ref : (1, O)
    o_ref  : (B, S*O)     lane-contiguous output; wrapper reshapes to (B, S, O)
    """
    cast = lambda a: a.astype(mxu_dtype)

    # Shared projection of the conditioning input: computed ONCE, reused by all
    # simulations (instead of S redundant x@W1x passes).
    hx = jnp.dot(cast(x_ref[...]), cast(w1x_ref[...]),
                 preferred_element_type=jnp.float32)                 # [B, H]

    # Per-simulation noise projection: one tall matmul over S*B rows so the MXU
    # sees a single M=S*B push rather than S tiny ones.
    hz = jnp.dot(cast(z_ref[...]), cast(w1z_ref[...]),
                 preferred_element_type=jnp.float32)                 # [S*B, H]

    # Broadcast the shared term to every simulation (sublane-tiled copy; B is a
    # multiple of 8 so this is layout-preserving).
    hx_all = jnp.tile(hx, (n_sim, 1))                                # [S*B, H]

    h = jnp.maximum(hz + hx_all + b1_ref[...].astype(jnp.float32), 0.0)

    y = jnp.dot(cast(h), cast(w2_ref[...]),
                preferred_element_type=jnp.float32)
    y = y + b2_ref[...].astype(jnp.float32)                          # [S*B, O]

    # Simulation s -> columns [s*O, (s+1)*O) of the (B, S*O) output slab, so the
    # wrapper's [B, S, O] result is a contiguous reshape (no transpose pass).
    for s in range(n_sim):                                           # static unroll
        o_ref[:, s * out_dim:(s + 1) * out_dim] = (
            y[s * batch:(s + 1) * batch, :].astype(o_ref.dtype))


def wrap_gen_multiple_simulations(x, params, noise, n_simulations,
                                  compute_dtype=jnp.float32):
    """Pallas-backed forward of WrapGenMultipleSimulations.

    Args:
      x:      [batch, in_dim]  conditioning input (same for every simulation).
      params: dict with 'w1x' [in_dim,H], 'w1z' [noise_dim,H], 'b1' [1,H],
              'w2' [H,O], 'b2' [1,O]   (W1 split into x / noise halves).
      noise:  [n_simulations, batch, noise_dim]  per-simulation latent noise.
      n_simulations: int (static).
      compute_dtype: dtype fed to the MXU (f32 accumulation regardless);
                     jnp.bfloat16 recommended on v6e/v7x for large generators.

    Returns:
      [batch, n_simulations, out_dim]
    """
    w1x, w1z, b1, w2, b2 = (params["w1x"], params["w1z"], params["b1"],
                            params["w2"], params["b2"])
    batch, in_dim = x.shape
    s_count = n_simulations
    noise_dim = noise.shape[-1]
    hidden = w1x.shape[1]
    out_dim = w2.shape[1]
    assert noise.shape == (s_count, batch, noise_dim)
    assert w1x.shape == (in_dim, hidden) and w1z.shape == (noise_dim, hidden)

    # Simulation-major flatten: free, contiguous reshape (no data movement).
    z_flat = noise.reshape(s_count * batch, noise_dim)

    kernel = functools.partial(
        _gen_all_sims_kernel,
        n_sim=s_count, batch=batch, out_dim=out_dim, mxu_dtype=compute_dtype)

    out = pl.pallas_call(
        kernel,
        out_shape=jax.ShapeDtypeStruct((batch, s_count * out_dim), x.dtype),
        grid=(1,),  # single invocation: all simulations folded into the M dim
        in_specs=[
            pl.BlockSpec((batch, in_dim), lambda i: (0, 0)),            # x
            pl.BlockSpec((s_count * batch, noise_dim), lambda i: (0, 0)),  # noise
            pl.BlockSpec((in_dim, hidden), lambda i: (0, 0)),           # w1x
            pl.BlockSpec((noise_dim, hidden), lambda i: (0, 0)),        # w1z
            pl.BlockSpec((1, hidden), lambda i: (0, 0)),                # b1
            pl.BlockSpec((hidden, out_dim), lambda i: (0, 0)),          # w2
            pl.BlockSpec((1, out_dim), lambda i: (0, 0)),               # b2
        ],
        out_specs=pl.BlockSpec((batch, s_count * out_dim), lambda i: (0, 0)),
        compiler_params=pltpu.CompilerParams(
            dimension_semantics=("parallel",),
        ),
    )(x, z_flat, w1x, w1z, b1, w2, b2)                    # [B, S*O]

    # torch.stack(outputs, dim=1) -> [batch, n_sim, out]; reshape is free
    # (columns were written simulation-major), atleast_3d is a no-op.
    return out.reshape(batch, s_count, out_dim)


def _init_params(key, in_dim, noise_dim, hidden, out_dim):
    d = in_dim + noise_dim
    k1, k2, k3, k4 = jax.random.split(key, 4)
    scale1 = 1.0 / jnp.sqrt(d)
    scale2 = 1.0 / jnp.sqrt(hidden)
    w1 = jax.random.normal(k1, (d, hidden), jnp.float32) * scale1
    return {
        "w1x": w1[:in_dim],                       # split W1 -> shared x half
        "w1z": w1[in_dim:],                       #            per-sim noise half
        "b1": jax.random.normal(k2, (1, hidden), jnp.float32) * 0.01,
        "w2": jax.random.normal(k3, (hidden, out_dim), jnp.float32) * scale2,
        "b2": jax.random.normal(k4, (1, out_dim), jnp.float32) * 0.01,
    }


if __name__ == "__main__":
    key = jax.random.PRNGKey(0)
    k_x, k_p, k_n = jax.random.split(key, 3)

    batch, in_dim, noise_dim, hidden, out_dim = 8, 16, 16, 64, 32
    n_simulations = 3

    x = jax.random.normal(k_x, (batch, in_dim), jnp.float32)
    params = _init_params(k_p, in_dim, noise_dim, hidden, out_dim)
    noise = jax.random.normal(
        k_n, (n_simulations, batch, noise_dim), jnp.float32)

    # Pure-JAX reference (same math, no Pallas).
    def ref_net(xi, zi):
        h = jnp.maximum(xi @ params["w1x"] + zi @ params["w1z"] + params["b1"],
                        0.0)
        return h @ params["w2"] + params["b2"]

    y_ref = jnp.stack([ref_net(x, noise[s]) for s in range(n_simulations)],
                      axis=1)                                   # [B, S, O]

    # f32 MXU path — tight check.
    y = wrap_gen_multiple_simulations(x, params, noise, n_simulations,
                                      compute_dtype=jnp.float32)
    y = jax.block_until_ready(y)
    assert y.shape == (batch, n_simulations, out_dim), y.shape
    assert jnp.allclose(y, y_ref, atol=1e-4, rtol=1e-4)

    # bf16 MXU path (v6e/v7x recommendation) — loose check (bf16 mantissa).
    y_bf16 = wrap_gen_multiple_simulations(x, params, noise, n_simulations,
                                           compute_dtype=jnp.bfloat16)
    y_bf16 = jax.block_until_ready(y_bf16)
    assert y_bf16.shape == (batch, n_simulations, out_dim), y_bf16.shape
    assert jnp.allclose(y_bf16, y_ref, atol=0.25, rtol=0.05)

    print("KERNEL_OK")
</pallas_src>

<mosaic_0001>
module attributes {stable_mosaic.version = 11 : i64} {
  func.func @_gen_all_sims_kernel(%arg0: i32, %arg1: memref<8x16xf32, #tpu.memory_space<vmem>>, %arg2: memref<24x16xf32, #tpu.memory_space<vmem>>, %arg3: memref<16x64xf32, #tpu.memory_space<vmem>>, %arg4: memref<16x64xf32, #tpu.memory_space<vmem>>, %arg5: memref<1x64xf32, #tpu.memory_space<vmem>>, %arg6: memref<64x32xf32, #tpu.memory_space<vmem>>, %arg7: memref<1x32xf32, #tpu.memory_space<vmem>>, %arg8: memref<8x96xf32, #tpu.memory_space<vmem>>) attributes {dimension_semantics = [#tpu.dimension_semantics<parallel>], iteration_bounds = array<i64: 1>, scalar_prefetch = 0 : i64, scratch_operands = 0 : i64, tpu.core_type = #tpu.core_type<tc>, window_params = [{pipeline_mode = #tpu.pipeline_mode<synchronous>, transform_indices = @transform_0, window_bounds = array<i64: 8, 16>}, {pipeline_mode = #tpu.pipeline_mode<synchronous>, transform_indices = @transform_1, window_bounds = array<i64: 24, 16>}, {pipeline_mode = #tpu.pipeline_mode<synchronous>, transform_indices = @transform_2, window_bounds = array<i64: 16, 64>}, {pipeline_mode = #tpu.pipeline_mode<synchronous>, transform_indices = @transform_3, window_bounds = array<i64: 16, 64>}, {pipeline_mode = #tpu.pipeline_mode<synchronous>, transform_indices = @transform_4, window_bounds = array<i64: 1, 64>}, {pipeline_mode = #tpu.pipeline_mode<synchronous>, transform_indices = @transform_5, window_bounds = array<i64: 64, 32>}, {pipeline_mode = #tpu.pipeline_mode<synchronous>, transform_indices = @transform_6, window_bounds = array<i64: 1, 32>}, {pipeline_mode = #tpu.pipeline_mode<synchronous>, transform_indices = @transform_7, window_bounds = array<i64: 8, 96>}]} {
    %c0 = arith.constant 0 : index
    %c0_0 = arith.constant 0 : index
    %0 = vector.load %arg1[%c0, %c0_0] : memref<8x16xf32, #tpu.memory_space<vmem>>, vector<8x16xf32>
    %c0_1 = arith.constant 0 : index
    %c0_2 = arith.constant 0 : index
    %1 = vector.load %arg3[%c0_1, %c0_2] : memref<16x64xf32, #tpu.memory_space<vmem>>, vector<16x64xf32>
    %cst = arith.constant dense<0.000000e+00> : vector<8x64xf32>
    %2 = tpu.matmul %0, %1, %cst {dimension_numbers = #tpu.dot_dimension_numbers<[1], [0], [0], [1], [0, 0, 1, 1], [], []>} : vector<8x16xf32>, vector<16x64xf32>, vector<8x64xf32> -> vector<8x64xf32>
    %c0_3 = arith.constant 0 : index
    %c0_4 = arith.constant 0 : index
    %3 = vector.load %arg2[%c0_3, %c0_4] : memref<24x16xf32, #tpu.memory_space<vmem>>, vector<24x16xf32>
    %c0_5 = arith.constant 0 : index
    %c0_6 = arith.constant 0 : index
    %4 = vector.load %arg4[%c0_5, %c0_6] : memref<16x64xf32, #tpu.memory_space<vmem>>, vector<16x64xf32>
    %cst_7 = arith.constant dense<0.000000e+00> : vector<24x64xf32>
    %5 = tpu.matmul %3, %4, %cst_7 {dimension_numbers = #tpu.dot_dimension_numbers<[1], [0], [0], [1], [0, 0, 1, 1], [], []>} : vector<24x16xf32>, vector<16x64xf32>, vector<24x64xf32> -> vector<24x64xf32>
    %6 = tpu.concatenate %2, %2, %2 in 0 : vector<8x64xf32>, vector<8x64xf32>, vector<8x64xf32> -> vector<24x64xf32>
    %7 = arith.addf %5, %6 : vector<24x64xf32>
    %c0_8 = arith.constant 0 : index
    %c0_9 = arith.constant 0 : index
    %8 = vector.load %arg5[%c0_8, %c0_9] : memref<1x64xf32, #tpu.memory_space<vmem>>, vector<1x64xf32>
    %9 = vector.broadcast %8 : vector<1x64xf32> to vector<24x64xf32>
    %10 = arith.addf %7, %9 : vector<24x64xf32>
    %cst_10 = arith.constant 0.000000e+00 : f32
    %11 = vector.broadcast %cst_10 : f32 to vector<24x64xf32>
    %12 = arith.maximumf %10, %11 : vector<24x64xf32>
    %c0_11 = arith.constant 0 : index
    %c0_12 = arith.constant 0 : index
    %13 = vector.load %arg6[%c0_11, %c0_12] : memref<64x32xf32, #tpu.memory_space<vmem>>, vector<64x32xf32>
    %cst_13 = arith.constant dense<0.000000e+00> : vector<24x32xf32>
    %14 = tpu.matmul %12, %13, %cst_13 {dimension_numbers = #tpu.dot_dimension_numbers<[1], [0], [0], [1], [0, 0, 1, 1], [], []>} : vector<24x64xf32>, vector<64x32xf32>, vector<24x32xf32> -> vector<24x32xf32>
    %c0_14 = arith.constant 0 : index
    %c0_15 = arith.constant 0 : index
    %15 = vector.load %arg7[%c0_14, %c0_15] : memref<1x32xf32, #tpu.memory_space<vmem>>, vector<1x32xf32>
    %16 = vector.broadcast %15 : vector<1x32xf32> to vector<24x32xf32>
    %17 = arith.addf %14, %16 : vector<24x32xf32>
    %18 = vector.extract_strided_slice %17 {offsets = [0, 0], sizes = [8, 32], strides = [1, 1]} : vector<24x32xf32> to vector<8x32xf32>
    %c0_16 = arith.constant 0 : index
    %c0_17 = arith.constant 0 : index
    %19 = vector.load %arg8[%c0_16, %c0_17] : memref<8x96xf32, #tpu.memory_space<vmem>>, vector<8x32xf32>
    tpu.vector_store %arg8[%c0_16, %c0_17], %18 {strides = array<i32>} : memref<8x96xf32, #tpu.memory_space<vmem>>, vector<8x32xf32>,
    %20 = vector.extract_strided_slice %17 {offsets = [8, 0], sizes = [8, 32], strides = [1, 1]} : vector<24x32xf32> to vector<8x32xf32>
    %c0_18 = arith.constant 0 : index
    %c32 = arith.constant 32 : index
    %21 = vector.load %arg8[%c0_18, %c32] : memref<8x96xf32, #tpu.memory_space<vmem>>, vector<8x32xf32>
    tpu.vector_store %arg8[%c0_18, %c32], %20 {strides = array<i32>} : memref<8x96xf32, #tpu.memory_space<vmem>>, vector<8x32xf32>,
    %22 = vector.extract_strided_slice %17 {offsets = [16, 0], sizes = [8, 32], strides = [1, 1]} : vector<24x32xf32> to vector<8x32xf32>
    %c0_19 = arith.constant 0 : index
    %c64 = arith.constant 64 : index
    %23 = vector.load %arg8[%c0_19, %c64] : memref<8x96xf32, #tpu.memory_space<vmem>>, vector<8x32xf32>
    tpu.vector_store %arg8[%c0_19, %c64], %22 {strides = array<i32>} : memref<8x96xf32, #tpu.memory_space<vmem>>, vector<8x32xf32>,
    return
  }
  func.func @transform_0(%arg0: i32) -> (i32, i32) {
    %c0_i32 = arith.constant 0 : i32
    %c0_i32_0 = arith.constant 0 : i32
    %c0_i32_1 = arith.constant 0 : i32
    return %c0_i32, %c0_i32_0 : i32, i32
  }
  func.func @transform_1(%arg0: i32) -> (i32, i32) {
    %c0_i32 = arith.constant 0 : i32
    %c0_i32_0 = arith.constant 0 : i32
    %c0_i32_1 = arith.constant 0 : i32
    return %c0_i32, %c0_i32_0 : i32, i32
  }
  func.func @transform_2(%arg0: i32) -> (i32, i32) {
    %c0_i32 = arith.constant 0 : i32
    %c0_i32_0 = arith.constant 0 : i32
    %c0_i32_1 = arith.constant 0 : i32
    return %c0_i32, %c0_i32_0 : i32, i32
  }
  func.func @transform_3(%arg0: i32) -> (i32, i32) {
    %c0_i32 = arith.constant 0 : i32
    %c0_i32_0 = arith.constant 0 : i32
    %c0_i32_1 = arith.constant 0 : i32
    return %c0_i32, %c0_i32_0 : i32, i32
  }
  func.func @transform_4(%arg0: i32) -> (i32, i32) {
    %c0_i32 = arith.constant 0 : i32
    %c0_i32_0 = arith.constant 0 : i32
    %c0_i32_1 = arith.constant 0 : i32
    return %c0_i32, %c0_i32_0 : i32, i32
  }
  func.func @transform_5(%arg0: i32) -> (i32, i32) {
    %c0_i32 = arith.constant 0 : i32
    %c0_i32_0 = arith.constant 0 : i32
    %c0_i32_1 = arith.constant 0 : i32
    return %c0_i32, %c0_i32_0 : i32, i32
  }
  func.func @transform_6(%arg0: i32) -> (i32, i32) {
    %c0_i32 = arith.constant 0 : i32
    %c0_i32_0 = arith.constant 0 : i32
    %c0_i32_1 = arith.constant 0 : i32
    return %c0_i32, %c0_i32_0 : i32, i32
  }
  func.func @transform_7(%arg0: i32) -> (i32, i32) {
    %c0_i32 = arith.constant 0 : i32
    %c0_i32_0 = arith.constant 0 : i32
    %c0_i32_1 = arith.constant 0 : i32
    return %c0_i32, %c0_i32_0 : i32, i32
  }
}

</mosaic_0001>

<bundles_post_ra>
// kernel: tpu_custom_call.1
= control target key start
LH: loop header
LB: loop body
LE: loop exit
PB: predicated region body
PF: predicated region fallthrough
CT: control target
= control target key end

     0   :  { %v465_v2 = vmov 0.0|0.0   ;;  %vm466_vm0 = vmmov 0   ;;  %v467_v4 = vmov 0.0   ;;  %vm30_vm1 = vcmask 130048   ;;  %s595_s0 = inlined_call_operand.vmem [shape: f32[8,16], index: 0, kind: input, shape index: {}]   ;;  %s596_s1 = inlined_call_operand.vmem [shape: f32[24,16], index: 1, kind: input, shape index: {}]   ;;  %s597_s2 = inlined_call_operand.vmem [shape: f32[16,64], index: 2, kind: input, shape index: {}]   ;;  %s598_s3 = inlined_call_operand.vmem [shape: f32[16,64], index: 3, kind: input, shape index: {}]   ;;  %s599_s4 = inlined_call_operand.vmem [shape: f32[1,64], index: 4, kind: input, shape index: {}]   ;;  %s600_s5 = inlined_call_operand.vmem [shape: f32[64,32], index: 5, kind: input, shape index: {}]   ;;  %s601_s6 = inlined_call_operand.vmem [shape: f32[1,32], index: 6, kind: input, shape index: {}]   ;;  %s602_s7 = inlined_call_operand.hbm [shape: f32[8,96], index: 7, kind: output, shape index: {}]  }
   0x1   :  { %v28_v0 = vld [vmem:[%s597_s2] sm:$0xff]  ;;  %v29_v1 = vld [vmem:[%s597_s2 + $0x8] sm:$0xff]  ;;  %417 = vmatprep.subr.bf16.mxu1 %v465_v2  ;;  %376 = vmatprep.mubr.msk.f32.mxu1 %vm466_vm0, %v467_v4 }
   0x2   :  { %v418_v3 = vpack.c.bf16 %v29_v1, %v28_v0  ;;  %v107_v5 = vld [vmem:[%s598_s3] sm:$0xff]  ;;  %v108_v6 = vld [vmem:[%s598_s3 + $0x8] sm:$0xff]  ;;  %423 = vmatprep.subr.bf16.mxu0 %v465_v2  ;;  %408 = vmatprep.mubr.msk.f32.mxu0 %vm466_vm0, %v467_v4 }
   0x3   :  { %v211_v7 = vld [vmem:[%s600_s5] sm:$0xff]  ;;  %v421_v9 = vpack.c.bf16 %v108_v6, %v107_v5  ;;  %v212_v10 = vld [vmem:[%s600_s5 + $0x8] sm:$0xff] }
   0x4   :  { %419 = vmatpush3.bf16.msra.mxu1 %v418_v3  ;;  %v27_v8 = vld [vmem:[%s595_s0] sm:$0xff] }
   0x5   :  { %12 = vsyncpa [#allocation3], 0  ;;  %420 = vmatprep.subr.bf16.mxu1 %v465_v2  ;;  %v424_v11 = vpack.c.bf16 %v212_v10, %v211_v7  ;;  %v104_v12 = vld [vmem:[%s596_s1] sm:$0xff]  ;;  %v105_v13 = vld [vmem:[%s596_s1 + $0x8] sm:$0xff]  ;;  %vm226_vm2 = vcmask 523264   ;;  %vm316_vm3 = vcmask 261120  }
   0x6   :  { %v106_v14 = vld [vmem:[%s596_s1 + $0x10] sm:$0xff]  ;;  %v214_v16 = vld [vmem:[%s600_s5 + $0x18] sm:$0xff]  ;;  %v215_v18 = vld [vmem:[%s600_s5 + $0x20] sm:$0xff]  ;;  %s468_s8 = smov 32   ;;  %s469_s9 = smov 64   ;;  %vm322_vm4 = vcmask 523520  }
   0x7   :  { %377 = vmatmul.mubr.msk.f32.vlgmr.msra.gmra.mrb[0].mxu1 %vm30_vm1, %v27_v8  ;;  %425 = vmatpush3.bf16.msra.mxu0 %v424_v11  ;;  %v213_v15 = vld [vmem:[%s600_s5 + $0x10] sm:$0xff]  ;;  %v216_v19 = vld [vmem:[%s600_s5 + $0x28] sm:$0xff]  ;;  %v218_v22 = vld [vmem:[%s600_s5 + $0x38] sm:$0xff]  ;;  %s470_s10 = smov [#allocation2]   ;;  %vm328_vm5 = vcmask 785920  }
   0x8   :  { %422 = vmatpush3.bf16.msra.mxu1 %v421_v9  ;;  %383 = vmatprep.mubr.msk.f32.mxu1 %vm466_vm0, %v467_v4  ;;  %v427_v17 = vpack.c.bf16 %v214_v16, %v213_v15  ;;  %v430_v20 = vpack.c.bf16 %v216_v19, %v215_v18  ;;  %v217_v21 = vld [vmem:[%s600_s5 + $0x30] sm:$0xff]  ;;  %v348_v27 = vld [vmem:[%s599_s4] ss:$0 sm:$0xff]  ;;  %s336_s2 = sshll.u32 %s470_s10, 4  ;;  %s337_s2 = int_to_ptr.vmem [resolvable:$true] %s336_s2 }
   0x9   :  { %426 = vmatprep.subr.bf16.mxu0 %v465_v2  ;;  %v433_v23 = vpack.c.bf16 %v218_v22, %v217_v21  ;;  %v349_v42 = vld [vmem:[%s601_s6] ss:$0 sm:$0xff]  ;;  %s441_s6 = scalar_lea.vmem %s337_s2, 128  ;;  %p446_p1 = scmp.lt.s32.totalorder %s337_s2, %s337_s2 }
   0xa   :  { %p442_p0 = scmp.ne.s32.totalorder %s337_s2, %s441_s6  ;;  %p447_p2 = scmp.lt.s32.totalorder %s441_s6, %s441_s6 }
   0xb   :  { %384 = vmatmul.mubr.msk.f32.vlgmr.msra.gmra.mrb[2].mxu1 %vm30_vm1, %v104_v12  ;;  %428 = vmatpush3.bf16.msra.mxu0 %v427_v17 }
   0xc   :  { %386 = vmatprep.mubr.msk.f32.mxu1 %vm466_vm0, %v467_v4  ;;  %429 = vmatprep.subr.bf16.mxu0 %v465_v2  ;;  %p448_p3 = por %p447_p2, %p446_p1 }
   0xe   :  { %p449_p4 = pnand %p448_p3, %p442_p0 }
   0xf   :  { %387 = vmatmul.mubr.msk.f32.gmra.mrb[4].mxu1 %vm30_vm1, %v105_v13  ;;  %431 = vmatpush3.bf16.msra.mxu0 %v430_v20 }
  0x10   :  { %389 = vmatprep.mubr.msk.f32.mxu1 %vm466_vm0, %v467_v4  ;;  %432 = vmatprep.subr.bf16.mxu0 %v465_v2 }
  0x13   :  { %390 = vmatmul.mubr.msk.f32.gmra.mrb[6].mxu1 %vm30_vm1, %v106_v14  ;;  %434 = vmatpush3.bf16.msra.mxu0 %v433_v23 }
  0xda   :  { %v100_v24 = vpop.f32.mrb[0].mxu1 }
  0xdb   :  { %v378_v25 = vpop.f32.mrb[1].mxu1 }
  0xde   :  { %v184_v26 = vpop.f32.mrb[2].mxu1 }
  0xdf   :  { %v185_v28 = vadd.f32 %v184_v26, %v100_v24  ;;  %v385_v29 = vpop.f32.mrb[3].mxu1 }
  0xe1   :  { %v205_v30 = vadd.f32 %v348_v27, %v185_v28 }
  0xe2   :  { %v189_v31 = vpop.f32.mrb[4].mxu1 }
  0xe3   :  { %v208_v32 = vmax.f32 %v205_v30, 0.0  ;;  %v190_v33 = vadd.f32 %v189_v31, %v100_v24  ;;  %v388_v34 = vpop.f32.mrb[5].mxu1 }
  0xe5   :  { %v206_v35 = vadd.f32 %v348_v27, %v190_v33  ;;  %409 = vmatmul.mubr.msk.f32.vlgmr.msra.gmra.mrb[0].mxu0 %vm226_vm2, %v208_v32 }
  0xe6   :  { %v194_v36 = vpop.f32.mrb[6].mxu1  ;;  %411 = vmatprep.mubr.msk.f32.mxu0 %vm466_vm0, %v467_v4 }
  0xe7   :  { %v209_v37 = vmax.f32 %v206_v35, 0.0  ;;  %v195_v38 = vadd.f32 %v194_v36, %v100_v24  ;;  %v391_v39 = vpop.f32.mrb[7].mxu1 }
  0xe9   :  { %v207_v40 = vadd.f32 %v348_v27, %v195_v38  ;;  %412 = vmatmul.mubr.msk.f32.gmra.mrb[2].mxu0 %vm226_vm2, %v209_v37 }
  0xea   :  { %414 = vmatprep.mubr.msk.f32.mxu0 %vm466_vm0, %v467_v4 }
  0xeb   :  { %v210_v41 = vmax.f32 %v207_v40, 0.0 }
  0xed   :  { %415 = vmatmul.mubr.msk.f32.gmra.mrb[4].mxu0 %vm226_vm2, %v210_v41 }
 0x1b8   :  { %v302_v43 = vpop.f32.mrb[0].mxu0 }
 0x1b9   :  { %v303_v44 = vadd.f32 %v349_v42, %v302_v43  ;;  %v410_v45 = vpop.f32.mrb[1].mxu0 }
 0x1bb   :  { %317 = vst.msk [vmem:[#allocation2] sm:$0xff] %vm316_vm3, %v303_v44 }
 0x1bc   :  { %v307_v46 = vpop.f32.mrb[2].mxu0 }
 0x1bd   :  { %v308_v47 = vadd.f32 %v349_v42, %v307_v46  ;;  %v413_v48 = vpop.f32.mrb[3].mxu0 }
 0x1bf   :  { %319 = vrot.lane.b32.xlu0 %v308_v47, %s468_s8 }
 0x1c0   :  { %v312_v49 = vpop.f32.mrb[4].mxu0 }
 0x1c1   :  { %v313_v50 = vadd.f32 %v349_v42, %v312_v49  ;;  %v416_v51 = vpop.f32.mrb[5].mxu0 }
 0x1c3   :  { %325 = vrot.lane.b32.xlu0 %v313_v50, %s469_s9 }
 0x231   :  { %v320_v52 = vpop.permute.xlu0 %319 }
 0x232   :  { %323 = vst.msk [vmem:[#allocation2] sm:$0xff] %vm322_vm4, %v320_v52 }
 0x235   :  { %v326_v53 = vpop.permute.xlu0 %325 }
 0x236   :  { %329 = vst.msk [vmem:[#allocation2] sm:$0xff] %vm328_vm5, %v326_v53 }
 0x237   :  { %452 = shalt.err (!%p449_p4)
}
 0x238   :  { %s453_s13 = scalar_lea.hbm %s602_s7, 128 }
 0x239   :  { %p454_p5 = scmp.ne.s32.totalorder %s602_s7, %s453_s13  ;;  %p457_p6 = scmp.lt.u32.totalorder %s453_s13, %s602_s7 }
 0x23b   :  { %p459_p7 = pnand %p457_p6, %p454_p5 }
 0x23d   :  { %462 = shalt.err (!%p459_p7)
}
 0x23e   :  { %339 = dma.vmem_to_hbm [thread:$0]  %s337_s2, 128, %s602_s7, [#allocation3]  }
 0x23f   :  { %463 = dma.done.wait [#allocation3], 128  }
 0x240   :  { %464 = vsyncadd [#allocation3], 4294967168 }
 0x241   :  { %343 = vsyncpa [#allocation3], 1 }

</bundles_post_ra>
